<compile_context>
chip_gen: v5e
topology: v5e:2x2
jax: 0.10.0
libtpu: 0.0.40
codegen_flags: <defaults>
</compile_context>

<pallas_src>
import functools

import jax
import jax.numpy as jnp
from jax.experimental import pallas as pl
from jax.experimental.pallas import tpu as pltpu

INPUT_CHANNELS = 4
HIDDEN_CHANNELS = 32
MLP_WIDTH = 128
OUT_DIM = INPUT_CHANNELS * HIDDEN_CHANNELS  # 128


def _cde_mlp_kernel(z_ref, w1_ref, b1_ref, w2_ref, b2_ref, out_ref):
    # z_ref:  (TB, HIDDEN_CHANNELS)
    # w1_ref: (HIDDEN_CHANNELS, MLP_WIDTH), b1_ref: (1, MLP_WIDTH)   (f32)
    # w2_ref: (MLP_WIDTH, OUT_DIM),         b2_ref: (1, OUT_DIM)     (f32)
    # out_ref:(TB, OUT_DIM)
    z = z_ref[...]
    w1 = w1_ref[...]
    w2 = w2_ref[...]

    # Weights arrive already in the matmul dtype (pre-cast once in the wrapper
    # when bf16_matmul=True); only the streamed activation tile is cast here.
    if z.dtype != w1.dtype:
        z = z.astype(w1.dtype)

    h = jnp.dot(z, w1, preferred_element_type=jnp.float32)
    # tanh rides the EUP slot; hidden under DMA at these tile sizes.
    h = jnp.tanh(h + b1_ref[...])

    if h.dtype != w2.dtype:
        h = h.astype(w2.dtype)

    o = jnp.dot(h, w2, preferred_element_type=jnp.float32)
    o = o + b2_ref[...]
    out_ref[...] = o.astype(out_ref.dtype)


def _round_up(x, m):
    return ((x + m - 1) // m) * m


def cde_func(z, w1, b1, w2, b2, *, tb=2048, bf16_matmul=False,
             out_dtype=jnp.float32):
    """Pallas implementation of CDEFunc.forward.

    Args:
      z:  (..., hidden_channels) float32 (or bfloat16)
      w1: (hidden_channels, 128), b1: (128,)
      w2: (128, input_channels*hidden_channels), b2: (input_channels*hidden_channels,)
      tb: target batch tile (rows per grid step). 2048 default; sweep
          2048/4096/8192 (footprint ~5/9/18 MiB — all fit scoped VMEM).
      bf16_matmul: cast matmul operands to bf16 (f32 accumulation). Weights are
          cast once in the wrapper. Recommended on v7x/v6e after numerical
          sign-off against the ODE solver tolerances.
      out_dtype: output element type. bf16 cuts ~40% of total HBM bytes on this
          memory-bound kernel (opt-in, same sign-off caveat).
    Returns:
      (..., hidden_channels, input_channels) in out_dtype.
    """
    batch_shape = z.shape[:-1]
    hc = z.shape[-1]
    assert hc == HIDDEN_CHANNELS
    zf = z.reshape(-1, hc)
    B = zf.shape[0]

    # Sublane packing: bf16 activations pack 16 rows per vreg, f32 pack 8.
    sublane = 16 if zf.dtype == jnp.bfloat16 else 8

    # Effective tile: at most tb, at most the (rounded) batch, and capped so the
    # grid has >= 2 steps (keeps both v7x TensorCores busy; neutral elsewhere).
    two_step_cap = _round_up(pl.cdiv(B, 2), sublane)
    tb_eff = max(sublane,
                 min(_round_up(tb, sublane), _round_up(B, sublane), two_step_cap))

    # Ragged grid: no wrapper pad / slice. The last block is masked by Pallas
    # (OOB rows are read-only garbage feeding dropped writes; no cross-row use).
    grid = (pl.cdiv(B, tb_eff),)

    matmul_dtype = jnp.bfloat16 if bf16_matmul else w1.dtype
    w1_k = w1.astype(matmul_dtype)
    w2_k = w2.astype(matmul_dtype)
    b1_2d = b1.reshape(1, MLP_WIDTH).astype(jnp.float32)
    b2_2d = b2.reshape(1, OUT_DIM).astype(jnp.float32)

    # Advisory cost estimate: ~41 KFLOP and ~640 B (f32 in/out) of HBM traffic
    # per row, plus the one-time weight fetch.
    weight_bytes = (w1_k.size + w2_k.size) * w1_k.dtype.itemsize + 4 * (b1.size + b2.size)
    z_bytes = B * hc * zf.dtype.itemsize
    out_bytes = B * OUT_DIM * jnp.dtype(out_dtype).itemsize
    cost = pl.CostEstimate(
        flops=2 * B * (hc * MLP_WIDTH + MLP_WIDTH * OUT_DIM),
        transcendentals=B * MLP_WIDTH,
        bytes_accessed=z_bytes + out_bytes + weight_bytes,
    )

    out_flat = pl.pallas_call(
        _cde_mlp_kernel,
        out_shape=jax.ShapeDtypeStruct((B, OUT_DIM), out_dtype),
        grid_spec=pltpu.PrefetchScalarGridSpec(
            num_scalar_prefetch=0,
            grid=grid,
            in_specs=[
                # z tile streams over the grid; weights/biases have constant
                # index_maps so they stay VMEM-resident across steps.
                pl.BlockSpec((tb_eff, hc), lambda i: (i, 0)),
                pl.BlockSpec((hc, MLP_WIDTH), lambda i: (0, 0)),       # w1
                pl.BlockSpec((1, MLP_WIDTH), lambda i: (0, 0)),        # b1
                pl.BlockSpec((MLP_WIDTH, OUT_DIM), lambda i: (0, 0)),  # w2
                pl.BlockSpec((1, OUT_DIM), lambda i: (0, 0)),          # b2
            ],
            out_specs=pl.BlockSpec((tb_eff, OUT_DIM), lambda i: (i, 0)),
        ),
        compiler_params=pltpu.CompilerParams(
            # "parallel" lets v7x shard grid steps across both TensorCores;
            # neutral on single-TC v5e/v6e.
            dimension_semantics=("parallel",),
            # Footprint is < 20 MiB even at tb=8192; 32 MiB leaves headroom on
            # v7x (64 MiB physical) while covering large-tile sweeps on v5e.
            vmem_limit_bytes=32 << 20,
        ),
        cost_estimate=cost,
    )(zf, w1_k, b1_2d, w2_k, b2_2d)

    # z.view(*z.shape[:-1], hidden_channels, input_channels) — metadata only.
    return out_flat.reshape(*batch_shape, HIDDEN_CHANNELS, INPUT_CHANNELS)


def _reference(z, w1, b1, w2, b2):
    h = jnp.tanh(z @ w1 + b1)
    o = h @ w2 + b2
    return o.reshape(*z.shape[:-1], HIDDEN_CHANNELS, INPUT_CHANNELS)


if __name__ == "__main__":
    key = jax.random.PRNGKey(0)
    k_z, k_w1, k_b1, k_w2, k_b2 = jax.random.split(key, 5)

    # Deterministic synthetic parameters (PyTorch-Linear-style uniform fan-in bound).
    bound1 = 1.0 / jnp.sqrt(HIDDEN_CHANNELS)
    w1 = jax.random.uniform(k_w1, (HIDDEN_CHANNELS, MLP_WIDTH),
                            minval=-bound1, maxval=bound1, dtype=jnp.float32)
    b1 = jax.random.uniform(k_b1, (MLP_WIDTH,),
                            minval=-bound1, maxval=bound1, dtype=jnp.float32)
    bound2 = 1.0 / jnp.sqrt(MLP_WIDTH)
    w2 = jax.random.uniform(k_w2, (MLP_WIDTH, OUT_DIM),
                            minval=-bound2, maxval=bound2, dtype=jnp.float32)
    b2 = jax.random.uniform(k_b2, (OUT_DIM,),
                            minval=-bound2, maxval=bound2, dtype=jnp.float32)

    # Check 1: small shape (batch=2, seq=8 -> flattened batch 16), default tile.
    batch, seq = 2, 8
    z = jax.random.normal(k_z, (batch, seq, HIDDEN_CHANNELS), dtype=jnp.float32)
    out = jax.block_until_ready(cde_func(z, w1, b1, w2, b2))
    ref = _reference(z, w1, b1, w2, b2)
    assert out.shape == (batch, seq, HIDDEN_CHANNELS, INPUT_CHANNELS)
    assert jnp.allclose(out, ref, atol=1e-5, rtol=1e-5)

    # Check 2: non-divisible flattened batch + small tile -> ragged last block
    # (150 rows, tb=64 -> 3 grid steps, masked 22-row tail).
    z2 = jax.random.normal(k_z, (3, 50, HIDDEN_CHANNELS), dtype=jnp.float32)
    out2 = jax.block_until_ready(cde_func(z2, w1, b1, w2, b2, tb=64))
    ref2 = _reference(z2, w1, b1, w2, b2)
    assert out2.shape == (3, 50, HIDDEN_CHANNELS, INPUT_CHANNELS)
    assert jnp.allclose(out2, ref2, atol=1e-5, rtol=1e-5)

    # Check 3: bf16 MXU path (weights pre-cast in wrapper, f32 accumulation).
    out3 = jax.block_until_ready(cde_func(z2, w1, b1, w2, b2, tb=64, bf16_matmul=True))
    assert jnp.allclose(out3, ref2, atol=1e-1, rtol=1e-1)

    print("KERNEL_OK")
</pallas_src>

<mosaic_0001>
module attributes {stable_mosaic.version = 11 : i64} {
  func.func @_cde_mlp_kernel(%arg0: i32, %arg1: memref<8x32xf32, #tpu.memory_space<vmem>>, %arg2: memref<32x128xf32, #tpu.memory_space<vmem>>, %arg3: memref<1x128xf32, #tpu.memory_space<vmem>>, %arg4: memref<128x128xf32, #tpu.memory_space<vmem>>, %arg5: memref<1x128xf32, #tpu.memory_space<vmem>>, %arg6: memref<8x128xf32, #tpu.memory_space<vmem>>) attributes {dimension_semantics = [#tpu.dimension_semantics<parallel>], iteration_bounds = array<i64: 2>, scalar_prefetch = 0 : i64, scratch_operands = 0 : i64, tpu.core_type = #tpu.core_type<tc>, window_params = [{transform_indices = @transform_0, window_bounds = array<i64: 8, 32>}, {pipeline_mode = #tpu.pipeline_mode<synchronous>, transform_indices = @transform_1, window_bounds = array<i64: 32, 128>}, {pipeline_mode = #tpu.pipeline_mode<synchronous>, transform_indices = @transform_2, window_bounds = array<i64: 1, 128>}, {pipeline_mode = #tpu.pipeline_mode<synchronous>, transform_indices = @transform_3, window_bounds = array<i64: 128, 128>}, {pipeline_mode = #tpu.pipeline_mode<synchronous>, transform_indices = @transform_4, window_bounds = array<i64: 1, 128>}, {transform_indices = @transform_5, window_bounds = array<i64: 8, 128>}]} {
    %c0 = arith.constant 0 : index
    %c0_0 = arith.constant 0 : index
    %0 = vector.load %arg1[%c0, %c0_0] : memref<8x32xf32, #tpu.memory_space<vmem>>, vector<8x32xf32>
    %c0_1 = arith.constant 0 : index
    %c0_2 = arith.constant 0 : index
    %1 = vector.load %arg2[%c0_1, %c0_2] : memref<32x128xf32, #tpu.memory_space<vmem>>, vector<32x128xf32>
    %c0_3 = arith.constant 0 : index
    %c0_4 = arith.constant 0 : index
    %2 = vector.load %arg4[%c0_3, %c0_4] : memref<128x128xf32, #tpu.memory_space<vmem>>, vector<128x128xf32>
    %cst = arith.constant dense<0.000000e+00> : vector<8x128xf32>
    %3 = tpu.matmul %0, %1, %cst {dimension_numbers = #tpu.dot_dimension_numbers<[1], [0], [0], [1], [0, 0, 1, 1], [], []>} : vector<8x32xf32>, vector<32x128xf32>, vector<8x128xf32> -> vector<8x128xf32>
    %c0_5 = arith.constant 0 : index
    %c0_6 = arith.constant 0 : index
    %4 = vector.load %arg3[%c0_5, %c0_6] : memref<1x128xf32, #tpu.memory_space<vmem>>, vector<1x128xf32>
    %5 = vector.broadcast %4 : vector<1x128xf32> to vector<8x128xf32>
    %6 = arith.addf %3, %5 : vector<8x128xf32>
    %7 = math.tanh %6 : vector<8x128xf32>
    %cst_7 = arith.constant dense<0.000000e+00> : vector<8x128xf32>
    %8 = tpu.matmul %7, %2, %cst_7 {dimension_numbers = #tpu.dot_dimension_numbers<[1], [0], [0], [1], [0, 0, 1, 1], [], []>} : vector<8x128xf32>, vector<128x128xf32>, vector<8x128xf32> -> vector<8x128xf32>
    %c0_8 = arith.constant 0 : index
    %c0_9 = arith.constant 0 : index
    %9 = vector.load %arg5[%c0_8, %c0_9] : memref<1x128xf32, #tpu.memory_space<vmem>>, vector<1x128xf32>
    %10 = vector.broadcast %9 : vector<1x128xf32> to vector<8x128xf32>
    %11 = arith.addf %8, %10 : vector<8x128xf32>
    %c0_10 = arith.constant 0 : index
    %c0_11 = arith.constant 0 : index
    %12 = vector.load %arg6[%c0_10, %c0_11] : memref<8x128xf32, #tpu.memory_space<vmem>>, vector<8x128xf32>
    tpu.vector_store %arg6[%c0_10, %c0_11], %11 {strides = array<i32>} : memref<8x128xf32, #tpu.memory_space<vmem>>, vector<8x128xf32>,
    return
  }
  func.func @transform_0(%arg0: i32) -> (i32, i32) {
    %c0_i32 = arith.constant 0 : i32
    %c0_i32_0 = arith.constant 0 : i32
    return %arg0, %c0_i32 : i32, i32
  }
  func.func @transform_1(%arg0: i32) -> (i32, i32) {
    %c0_i32 = arith.constant 0 : i32
    %c0_i32_0 = arith.constant 0 : i32
    %c0_i32_1 = arith.constant 0 : i32
    return %c0_i32, %c0_i32_0 : i32, i32
  }
  func.func @transform_2(%arg0: i32) -> (i32, i32) {
    %c0_i32 = arith.constant 0 : i32
    %c0_i32_0 = arith.constant 0 : i32
    %c0_i32_1 = arith.constant 0 : i32
    return %c0_i32, %c0_i32_0 : i32, i32
  }
  func.func @transform_3(%arg0: i32) -> (i32, i32) {
    %c0_i32 = arith.constant 0 : i32
    %c0_i32_0 = arith.constant 0 : i32
    %c0_i32_1 = arith.constant 0 : i32
    return %c0_i32, %c0_i32_0 : i32, i32
  }
  func.func @transform_4(%arg0: i32) -> (i32, i32) {
    %c0_i32 = arith.constant 0 : i32
    %c0_i32_0 = arith.constant 0 : i32
    %c0_i32_1 = arith.constant 0 : i32
    return %c0_i32, %c0_i32_0 : i32, i32
  }
  func.func @transform_5(%arg0: i32) -> (i32, i32) {
    %c0_i32 = arith.constant 0 : i32
    %c0_i32_0 = arith.constant 0 : i32
    return %arg0, %c0_i32 : i32, i32
  }
}

</mosaic_0001>

<bundles_post_ra>
// kernel: tpu_custom_call.1
= control target key start
LH: loop header
LB: loop body
LE: loop exit
PB: predicated region body
PF: predicated region fallthrough
CT: control target
= control target key end

     0   :  { %10 = vsyncpa [#allocation3], 0  ;;  %s896_s0 = inlined_call_operand.hbm [shape: f32[16,32], index: 0, kind: input, shape index: {}]   ;;  %s897_s1 = inlined_call_operand.hbm [shape: f32[32,128], index: 1, kind: input, shape index: {}]   ;;  %s898_s2 = inlined_call_operand.vmem [shape: f32[1,128], index: 2, kind: input, shape index: {}]   ;;  %s899_s3 = inlined_call_operand.hbm [shape: f32[128,128], index: 3, kind: input, shape index: {}]   ;;  %s900_s4 = inlined_call_operand.vmem [shape: f32[1,128], index: 4, kind: input, shape index: {}]   ;;  %s901_s5 = inlined_call_operand.hbm [shape: f32[16,128], index: 5, kind: output, shape index: {}]  }
   0x1   :  { %12 = vsyncpa [#allocation3 + $0x1], 0 }
   0x2   :  { %13 = vsyncpa [#allocation6], 0 }
   0x3   :  { %14 = vsyncpa [#allocation4], 0 }
   0x4   :  { %16 = vsyncpa [#allocation4 + $0x1], 0  ;;  %s741_s18 = smov 0   ;;  %s743_s19 = smov 0  }
   0x5   :  { %s745_s20 = smov 0   ;;  %s747_s21 = smov 0  }
   0x6 LB: > { %s174_s24 = sshll.u32 %s897_s1, 4  ;;  %s765_s25 = sadd.s32 4294967295, %s705_s21   ;;  %s705_s21 = sphi %s747_s21, %s912_s21   ;;  %s701_s20 = sphi %s745_s20, %s911_s20   ;;  %s697_s19 = sphi %s743_s19, %s910_s19   ;;  %s693_s18 = sphi %s741_s18, %s909_s18   ;;  %s175_s24 = int_to_ptr.hbm [resolvable:$true] %s174_s24 }
   0x7   : > { %p456_p0 = scmp.ge.s32.totalorder %s705_s21, 1  ;;  %p43_p1 = scmp.eq.s32.totalorder %s765_s25, 0 }
   0x8   : > { %p163_p2 = scmp.lt.s32.totalorder %s705_s21, 3  ;;  %s707_s27 = smov [#allocation5]  }
   0x9   : > { %s176_s28 = sshll.u32 %s707_s27, 4  ;;  %s191_s6 = sshll.u32 %s899_s3, 4  ;;  %s177_s28 = int_to_ptr.vmem [resolvable:$true] %s176_s28  ;;  %s192_s6 = int_to_ptr.hbm [resolvable:$true] %s191_s6 }
   0xa   : > { %p770_p3 = pnand %p456_p0, %p163_p2  ;;  %s708_s7 = smov [#allocation7]  }
   0xb   : > { %s193_s8 = sshll.u32 %s708_s7, 4  ;;  %s709_s9 = smov 128   ;;  %s194_s8 = int_to_ptr.vmem [resolvable:$true] %s193_s8 }
   0xc   : > { %p484_p4 = pneg %p770_p3  ;;  %s710_s10 = smov 8  }
   0xd   : > { %s455_s11 = sadd.s32 4294967294, %s705_s21   ;;  %s784_s12 = sadd.s32 1, %s705_s21  }
   0xe   : > { %p485_p6 = pnand %p484_p4, %p43_p1  ;;  %s26_s13 = ssub.s32 %s705_s21, %s784_s12 }
   0xf   : > { %s29_s14 = sadd.s32 1, %s701_s20  ;;  %p27_p7 = scmp.eq.s32.totalorder %s26_s13, 0 }
  0x10   : > { %487 = dma.hbm_to_vmem [thread:$0]  (!%p485_p6), %s175_s24, 512, %s177_s28, [#allocation6], %s709_s9, %s709_s9, %s710_s10  }
  0x11   : > { %490 = dma.hbm_to_vmem [thread:$0]  (!%p485_p6), %s192_s6, 2048, %s194_s8, [#allocation6], %s709_s9, %s709_s9, %s710_s10  }
  0x12   : > { %p36_p8 = scmp.ne.s32.totalorder %s701_s20, %s697_s19  ;;  %p37_p9 = scmp.eq.s32.totalorder %s705_s21, 0 }
  0x13   : > { %p42_p10 = scmp.ne.s32.totalorder %s697_s19, %s693_s18  ;;  %p150_p13 = scmp.eq.s32.totalorder %s765_s25, 1 }
  0x14   : > { %s795_s15 = scalar_select %p27_p7, %s701_s20, %s29_s14  }
  0x15   : > { %p797_p11 = por %p37_p9, %p36_p8  ;;  %p803_p12 = por %p43_p1, %p42_p10 }
  0x16   : > { %p156_p0 = scmp.eq.s32.totalorder %s455_s11, 1  ;;  %p501_p2 = scmp.lt.s32.totalorder %s705_s21, 2 }
  0x17   : > { %s210_s22 = sand.u32 1, %s701_s20   ;;  %p810_p4 = por %p150_p13, %p36_p8 }
  0x18   : > { %p814_p6 = por %p156_p0, %p42_p10  ;;  %s460_s27 = sshll.u32 %s210_s22, 3 }
  0x19   : > { %s461_s28 = sshll.u32 %s705_s21, 3  ;;  %s214_s7 = scalar_lea.vmem [#allocation2], %s460_s27 }
  0x1a   : > { %s218_s6 = scalar_lea.hbm %s896_s0, %s461_s28  ;;  %s222_s8 = sshll.u32 %s214_s7, 4  ;;  %s223_s8 = int_to_ptr.vmem [resolvable:$true] %s222_s8 }
  0x1b   : > { %s220_s9 = sshll.u32 %s218_s6, 4  ;;  %p824_p7 = pnand %p501_p2, %p797_p11  ;;  %s221_s9 = int_to_ptr.hbm [resolvable:$true] %s220_s9 }
  0x1c   : > { %s211_s11 = scalar_lea.sflag [#allocation3], %s210_s22  ;;  %s605_s13 = sshra.s32 %s221_s9, 4  ;;  %s606_s13 = int_to_ptr.hbm [resolvable:$true] %s605_s13 }
  0x1d   : > { %s607_s14 = scalar_lea.hbm %s606_s13, 8  ;;  %p609_p9 = pneg %p824_p7 }
  0x1e   : > { %p608_p8 = scmp.ne.s32.totalorder %s606_s13, %s607_s14  ;;  %s612_s29 = scalar_lea.hbm %s896_s0, 16 }
  0x1f   : > { %p613_p11 = scmp.lt.s32.totalorder %s606_s13, %s896_s0  ;;  %p614_p0 = scmp.lt.s32.totalorder %s612_s29, %s607_s14 }
  0x20   : > { %p610_p10 = pnand %p609_p9, %p608_p8 }
  0x21   : > { %p615_p2 = por %p614_p0, %p613_p11 }
  0x22   : > { %p611_p13 = pneg %p610_p10 }
  0x24   : > { %p616_p5 = pnand %p615_p2, %p611_p13 }
  0x26   : > { %619 = shalt.err (!%p616_p5)
}
  0x27   : > { %494 = dma.hbm_to_vmem [thread:$0]  (!%p824_p7), %s221_s9, 128, %s223_s8, %s211_s11  }
  0x28   : > { %231 = sbr.rel (%p770_p3) target bundleno = 322 (0x142), region = 40  ;;  %s841_s22 = sand.u32 (!%p770_p3), 1, %s697_s19  }
  0x29   : > { %s463_s6 = sshll.u32 (!%p770_p3), %s841_s22, 3  ;;  %s234_s7 = scalar_lea.sflag (!%p770_p3), [#allocation3], %s841_s22 }
  0x2a   : > { %s237_s13 = scalar_lea.vmem (!%p770_p3), [#allocation2], %s463_s6 }
  0x2d   : > { %680 = dma.done.wait (%p803_p12), %s234_s7, 128  }
  0x2e   : > { %682 = vsyncadd (%p803_p12), %s234_s7, 4294967168 }
  0x2f   : > { %684 = dma.done.wait (%p43_p1), [#allocation6], 2560  }
  0x30   : > { %686 = vsyncadd (%p43_p1), [#allocation6], 4294964736  ;;  %v279_v0 = vld [vmem:[#allocation5 + $0x18] sm:$0xff]  ;;  %v278_v1 = vld [vmem:[#allocation5 + $0x10] sm:$0xff]  ;;  %vm300_vm0 = vcmask 261120   ;;  %s469_s8 = sshll.u32 %s765_s25, 3 }
  0x31   : > { %316 = vmatpush.msra.mxu0 %v279_v0  ;;  %v295_v2 = vld [vmem:[#allocation7 + $0x78] sm:$0xff]  ;;  %v277_v3 = vld [vmem:[#allocation5 + $0x8] sm:$0xff]  ;;  %v294_v4 = vld [vmem:[#allocation7 + $0x70] sm:$0xff]  ;;  %s361_s11 = scalar_lea.hbm %s901_s5, %s469_s8  ;;  %s274_s28 = scalar_lea.vmem [#allocation8], %s463_s6 }
  0x32   : > { %329 = vmatpush.msra.mxu1 %v295_v2  ;;  %v293_v5 = vld [vmem:[#allocation7 + $0x68] sm:$0xff]  ;;  %v276_v6 = vld [vmem:[#allocation5] sm:$0xff]  ;;  %v275_v7 = vld [vmem:[%s237_s13] sm:$0xff]  ;;  %s363_s29 = sshll.u32 %s274_s28, 4  ;;  %s365_s30 = sshll.u32 %s361_s11, 4  ;;  %s364_s29 = int_to_ptr.vmem [resolvable:$true] %s363_s29  ;;  %s366_s30 = int_to_ptr.hbm [resolvable:$true] %s365_s30 }
  0x33   : > { %317 = vmatpush.msra.mxu0 %v278_v1  ;;  %v292_v8 = vld [vmem:[#allocation7 + $0x60] sm:$0xff]  ;;  %v291_v9 = vld [vmem:[#allocation7 + $0x58] sm:$0xff]  ;;  %v290_v10 = vld [vmem:[#allocation7 + $0x50] sm:$0xff]  ;;  %s351_s16 = scalar_lea.sflag [#allocation4], %s841_s22  ;;  %s649_s25 = sshra.s32 %s366_s30, 4  ;;  %s650_s25 = int_to_ptr.hbm [resolvable:$true] %s649_s25 }
  0x34   : > { %330 = vmatpush.msra.mxu1 %v294_v4  ;;  %v289_v11 = vld [vmem:[#allocation7 + $0x48] sm:$0xff]  ;;  %v288_v12 = vld [vmem:[#allocation7 + $0x40] sm:$0xff]  ;;  %v287_v13 = vld [vmem:[#allocation7 + $0x38] sm:$0xff]  ;;  %s651_s7 = scalar_lea.hbm %s650_s25, 8  ;;  %s655_s17 = scalar_lea.hbm %s901_s5, 16 }
  0x35   : > { %318 = vmatpush.msra.mxu0 %v277_v3  ;;  %v286_v14 = vld [vmem:[#allocation7 + $0x30] sm:$0xff]  ;;  %v285_v15 = vld [vmem:[#allocation7 + $0x28] sm:$0xff]  ;;  %v284_v16 = vld [vmem:[#allocation7 + $0x20] sm:$0xff]  ;;  %p652_p1 = scmp.ne.s32.totalorder %s650_s25, %s651_s7  ;;  %p656_p12 = scmp.lt.s32.totalorder %s650_s25, %s901_s5 }
  0x36   : > { %331 = vmatpush.msra.mxu1 %v293_v5  ;;  %v283_v17 = vld [vmem:[#allocation7 + $0x18] sm:$0xff]  ;;  %v282_v18 = vld [vmem:[#allocation7 + $0x10] sm:$0xff]  ;;  %v281_v19 = vld [vmem:[#allocation7 + $0x8] sm:$0xff]  ;;  %p657_p7 = scmp.lt.s32.totalorder %s655_s17, %s651_s7 }
  0x37   : > { %319 = vmatpush.msra.mxu0 %v276_v6  ;;  %v280_v20 = vld [vmem:[#allocation7] sm:$0xff]  ;;  %v541_v21 = vld [vmem:[%s898_s2] ss:$0 sm:$0xff]  ;;  %p653_p3 = pnand %p652_p1, %p810_p4 }
  0x38   : > { %467 = vmatmul.msk.f32.vlgmr.msra.gmra.mxu0 %vm300_vm0, %v275_v7  ;;  %332 = vmatpush.msra.mxu1 %v292_v8  ;;  %v542_v25 = vld [vmem:[%s900_s4] ss:$0 sm:$0xff]  ;;  %p658_p8 = por %p657_p7, %p656_p12 }
  0x39   : > { %p654_p5 = pneg %p653_p3 }
  0x3a   : > { %333 = vmatpush.msra.mxu1 %v291_v9 }
  0x3b   : > { %p659_p9 = pnand %p658_p8, %p654_p5 }
  0x3c   : > { %334 = vmatpush.msra.mxu1 %v290_v10 }
  0x3e   : > { %335 = vmatpush.msra.mxu1 %v289_v11 }
  0x40   : > { %336 = vmatpush.msra.mxu1 %v288_v12 }
  0x42   : > { %337 = vmatpush.msra.mxu1 %v287_v13 }
  0x44   : > { %338 = vmatpush.msra.mxu1 %v286_v14 }
  0x46   : > { %339 = vmatpush.msra.mxu1 %v285_v15 }
  0x48   : > { %340 = vmatpush.msra.mxu1 %v284_v16 }
  0x4a   : > { %341 = vmatpush.msra.mxu1 %v283_v17 }
  0x4c   : > { %342 = vmatpush.msra.mxu1 %v282_v18 }
  0x4e   : > { %343 = vmatpush.msra.mxu1 %v281_v19 }
  0x50   : > { %344 = vmatpush.msra.mxu1 %v280_v20 }
  0xb5   : > { %v321_v22 = vpop.f32.mrf.mxu0 }
  0xb6   : > { %v322_v23 = vadd.f32 %v541_v21, %v321_v22 }
  0xb8   : > { %543 = vtanh.f32 %v322_v23 }
  0xbe   : > { %v544_v24 = vpop.eup %543 }
  0xbf   : > { %345 = vmatmul.f32.vlgmr.msra.gmra.mxu1 %v544_v24 }
 0x13c   : > { %v346_v26 = vpop.f32.mrf.mxu1 }
 0x13d   : > { %v347_v27 = vadd.f32 %v542_v25, %v346_v26 }
 0x13f   : > { %349 = vst [vmem:[%s274_s28] sm:$0xff] %v347_v27 }
 0x140   : > { %662 = shalt.err (!%p659_p9)
}
 0x141   : > { %482 = dma.vmem_to_hbm [thread:$0]  (%p810_p4), %s364_s29, 128, %s366_s30, %s351_s16  }
 0x142 PF: > { %s377_s22 = sand.u32 1, %s693_s18   ;;  %p908_p10 = scmp.ge.s32.totalorder %s705_s21, 2 }
 0x143   : > { %s378_s9 = scalar_lea.sflag [#allocation4], %s377_s22 }
 0x144   : > { %p496_p13 = pnand %p908_p10, %p814_p6 }
 0x146   : > { %p497_p11 = pneg %p496_p13 }
 0x148   : > { %688 = dma.done.wait (%p497_p11), %s378_s9, 128  }
 0x149   : > { %690 = vsyncadd (%p497_p11), %s378_s9, 4294967168  ;;  %p19_p0 = scmp.ge.s32.totalorder %s784_s12, 4   ;;  %s909_s18 = smov %s697_s19 }
 0x14a   : > { %s910_s19 = smov %s701_s20  ;;  %s911_s20 = smov %s795_s15 }
 0x14b   : > { %s912_s21 = smov %s784_s12  ;;  %21 = sbr.rel (!%p19_p0) target bundleno = 6 (0x6), region = 93 }
 0x150   :  { %384 = vsyncpa [#allocation3], 1 }
 0x151   :  { %386 = vsyncpa [#allocation3 + $0x1], 1 }
 0x152   :  { %387 = vsyncpa [#allocation6], 1 }
 0x153   :  { %388 = vsyncpa [#allocation4], 1 }
 0x154   :  { %390 = vsyncpa [#allocation4 + $0x1], 1 }

</bundles_post_ra>
